<compile_context>
chip_gen: v7x
topology: tpu7x:2x2x1
jax: 0.10.0
libtpu: 0.0.40
codegen_flags: <defaults>
</compile_context>

<pallas_src>
import math

import jax
import jax.numpy as jnp
from jax import lax
from jax.experimental import pallas as pl
from jax.experimental.pallas import tpu as pltpu


# ----------------------------------------------------------------------------
# Per-generation VMEM sizing (v5e/v6e 128 MiB physical, v7x 64 MiB)
# ----------------------------------------------------------------------------
def _vmem_capacity_bytes():
    try:
        return int(pltpu.get_tpu_info().vmem_capacity_bytes)
    except Exception:
        return 64 * 1024 * 1024          # conservative fallback (v7x per-core)


_VMEM_CAP = _vmem_capacity_bytes()
_VMEM_LIMIT = min(int(_VMEM_CAP * 3 // 4), 100 * 1024 * 1024)  # scoped-VMEM limit
_TILE_BUDGET = _VMEM_CAP // 2                                   # working-set target
_MIN_GRID = 4 if _VMEM_CAP <= 64 * 1024 * 1024 else 2           # keep v7x's 2 TCs fed
_SUBLANE_MULT = 16   # multiple-of-16 batch tiles keep bf16 (packed-sublane)
                     # blocks legal on the second-to-last axis


def _pick_batch_tile(B, per_row_bytes, fixed_bytes=0):
    """Pick (batch_tile, padded_B).

    Tiles are multiples of 16 (bf16 sublane packing) unless the whole batch
    fits one full block.  B is padded up instead of falling back to a single
    full-B block, the tile is the largest that fits the VMEM working-set
    budget, and (when possible) the grid keeps at least _MIN_GRID steps so
    double-buffering / megacore sharding stay alive."""
    if B <= _SUBLANE_MULT:
        return B, B                                   # single full block
    m = _SUBLANE_MULT
    Bp = ((B + m - 1) // m) * m
    tile = m
    for cand in range(m, Bp + 1, m):
        if Bp % cand != 0:
            continue
        fits = fixed_bytes + cand * per_row_bytes <= _TILE_BUDGET
        keeps_pipeline = (Bp // cand) >= _MIN_GRID or cand == m
        if fits and keeps_pipeline:
            tile = cand
    return tile, Bp


# ----------------------------------------------------------------------------
# Encoder kernel: fused embedding gather + masked mean pooling (+ L2 norm)
# ----------------------------------------------------------------------------
def _make_encode_kernel(normalize: bool, seq_len: int, batch_tile: int):
    def kernel(ids_ref, mask_ref, table_ref, out_ref, emb_ref):
        i = pl.program_id(0)
        row0 = i * batch_tile

        # --- fused token-embedding gather -----------------------------------
        # ids live in SMEM (scalar prefetch); the table is one VMEM-resident
        # block (constant index_map -> DMA'd from HBM once per call).  The
        # gathered (tb, L, D) tokens only ever exist in VMEM scratch.
        def gather_row(b, carry):
            def gather_tok(l, c):
                tok = ids_ref[row0 + b, l]
                emb_ref[b, pl.ds(l, 1), :] = table_ref[pl.ds(tok, 1), :]
                return c
            return lax.fori_loop(0, seq_len, gather_tok, carry)

        lax.fori_loop(0, batch_tile, gather_row, 0)

        # --- masked mean pooling on the MXU (f32 accumulation) --------------
        mask = mask_ref[...]                                  # (tb, L) f32
        summed = jnp.einsum('bql,bld->bqd', mask[:, None, :], emb_ref[...],
                            preferred_element_type=jnp.float32)[:, 0, :]
        count = jnp.sum(mask, axis=1, keepdims=True)
        # TODO(synk): all-zero mask rows clamp to one token (torch would emit
        # nan); only padded rows hit this path here.
        pooled = summed * pl.reciprocal(jnp.maximum(count, 1.0), approx=True)
        if normalize:
            sq = jnp.sum(pooled * pooled, axis=-1, keepdims=True)
            pooled = pooled * lax.rsqrt(jnp.maximum(sq, 1e-24))
        out_ref[...] = pooled.astype(out_ref.dtype)           # bf16 writeback

    return kernel


def encode_pooled(table, ids, mask, normalize):
    """table: (vocab, D) f32, ids/mask: (B, L) -> pooled (B, D) bf16."""
    B, L = ids.shape
    vocab, D = table.shape
    ids = ids.astype(jnp.int32)
    mask = mask.astype(jnp.float32)      # keep elementwise math f32 (v5e VPU)

    # Double-buffered per-batch-row bytes (mask in + bf16 pooled out) plus the
    # gather scratch; the resident table counted (conservatively) twice.
    per_row = 2 * L * 4 + 2 * D * 2 + L * D * 4
    fixed = 2 * vocab * D * 4
    tb, Bp = _pick_batch_tile(B, per_row, fixed)
    if Bp != B:                          # pad instead of a giant full-B block
        ids = jnp.pad(ids, ((0, Bp - B), (0, 0)))
        mask = jnp.pad(mask, ((0, Bp - B), (0, 0)))
    grid = (Bp // tb,)

    cost = pl.CostEstimate(
        flops=2 * Bp * L * D + 4 * Bp * D,
        transcendentals=2 * Bp,
        bytes_accessed=vocab * D * 4 + Bp * L * 8 + Bp * D * 2)

    out = pl.pallas_call(
        _make_encode_kernel(normalize, L, tb),
        out_shape=jax.ShapeDtypeStruct((Bp, D), jnp.bfloat16),
        grid_spec=pltpu.PrefetchScalarGridSpec(
            num_scalar_prefetch=1,                     # ids -> SMEM
            grid=grid,
            in_specs=[
                pl.BlockSpec((tb, L), lambda i, ids_ref: (i, 0)),
                pl.BlockSpec((vocab, D), lambda i, ids_ref: (0, 0)),
            ],
            out_specs=pl.BlockSpec((tb, D), lambda i, ids_ref: (i, 0)),
            scratch_shapes=[pltpu.VMEM((tb, L, D), jnp.float32)]),
        compiler_params=pltpu.CompilerParams(
            dimension_semantics=("parallel",),
            vmem_limit_bytes=_VMEM_LIMIT),
        cost_estimate=cost,
    )(ids, mask, table)
    return out[:B] if Bp != B else out


# ----------------------------------------------------------------------------
# Score + KD-loss kernel (batch-tiled, per-tile partial losses)
#   score[b,i] = <q[b,:], p[b,i,:]> / sqrt(D)
#   kl : KLDivLoss(log_softmax(score/T), softmax(gold/T)) * T^2 (reduction='mean')
#   mse: MSELoss(softmax(score), softmax(gold))                  (reduction='mean')
# ----------------------------------------------------------------------------
def _make_kd_loss_kernel(temperature: float, loss_type: str):
    t = float(temperature)

    def kernel(q_ref, p_ref, gold_ref, out_ref):
        q = q_ref[...]                                   # (tb, D)    bf16
        p = p_ref[...]                                   # (tb, N, D) bf16
        gold = gold_ref[...]                             # (tb, N)    f32
        D = q.shape[-1]

        # einsum('bd,bid->bi') on the MXU; bf16 operands, f32 accumulation.
        # TODO(synk): M=1 per-row matmuls underuse the 256-wide MXU; revisit
        # only if this becomes compute-visible (it is HBM-bound on `p` today).
        score = jnp.einsum('bqd,bnd->bqn', q[:, None, :], p,
                           preferred_element_type=jnp.float32)[:, 0, :]
        score = score * jnp.float32(1.0 / math.sqrt(D))

        if loss_type == 'kl':
            g = gold * jnp.float32(1.0 / t)
            s = score * jnp.float32(1.0 / t)
            g_shift = g - jnp.max(g, axis=-1, keepdims=True)
            g_exp = jnp.exp(g_shift)
            g_sm = g_exp * pl.reciprocal(
                jnp.sum(g_exp, axis=-1, keepdims=True), approx=False)
            s_shift = s - jnp.max(s, axis=-1, keepdims=True)
            lse = jnp.log(jnp.sum(jnp.exp(s_shift), axis=-1, keepdims=True))
            log_sm = s_shift - lse
            log_g = jnp.where(g_sm > 0, jnp.log(jnp.maximum(g_sm, 1e-38)), 0.0)
            elem = jnp.where(g_sm > 0, g_sm * (log_g - log_sm), 0.0)
            partial = jnp.sum(elem)
        else:  # 'mse' — exact softmax denominators (correctness feedback)
            g_shift = gold - jnp.max(gold, axis=-1, keepdims=True)
            g_exp = jnp.exp(g_shift)
            g_sm = g_exp * pl.reciprocal(
                jnp.sum(g_exp, axis=-1, keepdims=True), approx=False)
            s_shift = score - jnp.max(score, axis=-1, keepdims=True)
            s_exp = jnp.exp(s_shift)
            s_sm = s_exp * pl.reciprocal(
                jnp.sum(s_exp, axis=-1, keepdims=True), approx=False)
            diff = s_sm - g_sm
            partial = jnp.sum(diff * diff)

        # One lane-dense (8, 128) partial block per batch tile: no resident
        # accumulator, so the grid axis stays "parallel" (megacore on v7x).
        out_ref[...] = jnp.zeros((8, 128), jnp.float32) + partial

    return kernel


def kd_loss(q, p, gold, temperature, loss_type):
    """q: (B, D), p: (B, N, D), gold: (B, N) -> scalar loss."""
    assert loss_type in ('kl', 'mse')
    B, N, D = p.shape
    q = q.astype(jnp.bfloat16)
    p = p.astype(jnp.bfloat16)
    gold = gold.astype(jnp.float32)

    per_row = 2 * D * 2 + 3 * N * D * 2 + 2 * N * 4   # q(x2) + p(x3) + gold(x2)
    fixed = 4 * 8 * 128 * 4
    tb, Bp = _pick_batch_tile(B, per_row, fixed)
    if Bp != B:
        # Zero-padded rows give identical (uniform) teacher/student
        # distributions and contribute exactly 0 to both loss sums.
        pad = Bp - B
        q = jnp.pad(q, ((0, pad), (0, 0)))
        p = jnp.pad(p, ((0, pad), (0, 0), (0, 0)))
        gold = jnp.pad(gold, ((0, pad), (0, 0)))
    ntiles = Bp // tb

    if ntiles >= 3 and hasattr(pl, "Buffered"):
        p_spec = pl.BlockSpec((tb, N, D), lambda i: (i, 0, 0),
                              pipeline_mode=pl.Buffered(3))
    else:
        p_spec = pl.BlockSpec((tb, N, D), lambda i: (i, 0, 0))

    cost = pl.CostEstimate(
        flops=2 * Bp * N * D,
        transcendentals=4 * Bp * N,
        bytes_accessed=Bp * D * 2 + Bp * N * D * 2 + Bp * N * 4
        + ntiles * 8 * 128 * 4)

    partials = pl.pallas_call(
        _make_kd_loss_kernel(temperature, loss_type),
        out_shape=jax.ShapeDtypeStruct((ntiles * 8, 128), jnp.float32),
        grid=(ntiles,),
        in_specs=[
            pl.BlockSpec((tb, D), lambda i: (i, 0)),
            p_spec,
            pl.BlockSpec((tb, N), lambda i: (i, 0)),
        ],
        out_specs=pl.BlockSpec((8, 128), lambda i: (i, 0)),
        compiler_params=pltpu.CompilerParams(
            dimension_semantics=("parallel",),
            vmem_limit_bytes=_VMEM_LIMIT),
        cost_estimate=cost,
    )(q, p, gold)

    total = jnp.sum(partials.reshape(ntiles, 8, 128)[:, 0, 0])
    t = float(temperature)
    # TODO(synk): torch KLDivLoss default reduction='mean' divides by B*N;
    # if TART configures 'batchmean' this would need /B instead.
    if loss_type == 'kl':
        return total * jnp.float32(t * t / (B * N))
    return total * jnp.float32(1.0 / (B * N))


# ----------------------------------------------------------------------------
# Module wrapper (mirrors InBatch_KD.forward semantics)
# ----------------------------------------------------------------------------
class InBatchKDPallas:
    def __init__(self, embedding, norm_query=True, norm_doc=True,
                 loss_type='kl', temperature=1.0):
        assert loss_type in ('kl', 'mse')
        # The table stays f32: it is DMA'd once per encode call and stays
        # VMEM-resident, and 32-bit rows keep the in-kernel dynamic row
        # gather on an unpacked sublane layout.
        self.embedding = jnp.asarray(embedding, jnp.float32)   # (vocab, D)
        self.norm_query = norm_query
        self.norm_doc = norm_doc
        self.loss_type = loss_type
        self.temperature = float(temperature)

    def _encode(self, ids, mask, normalize):
        # Embedding gather is fused into the encode kernel (scalar-prefetched
        # ids + VMEM-resident table): no (B, L, D) intermediate in HBM.
        return encode_pooled(self.embedding, ids, mask, normalize)

    def forward(self, question_ids, question_mask, passage_ids, passage_mask,
                gold_score, stats_prefix='', iter_stats=None):
        if iter_stats is None:
            iter_stats = {}
        question_output = self._encode(question_ids, question_mask, self.norm_query)
        bsz, n_passages, plen = passage_ids.shape
        p_ids = passage_ids.reshape(bsz * n_passages, plen)
        p_mask = passage_mask.reshape(bsz * n_passages, plen)
        passage_output = self._encode(p_ids, p_mask, self.norm_doc)
        passage_output = passage_output.reshape(bsz, n_passages, -1)

        loss = kd_loss(question_output, passage_output, gold_score,
                       self.temperature, self.loss_type)

        if len(stats_prefix) > 0:
            stats_prefix = stats_prefix + '/'
        iter_stats[f'{stats_prefix}loss'] = (float(loss), bsz)
        return loss, iter_stats


# ----------------------------------------------------------------------------
# Pure-JAX reference (for a numerical sanity check in main)
# ----------------------------------------------------------------------------
def _reference_loss(embedding, q_ids, q_mask, p_ids, p_mask, gold,
                    norm_q, norm_d, loss_type, temperature):
    emb = jnp.asarray(embedding, jnp.float32)

    def enc(ids, mask, norm):
        e = emb[ids]
        m = mask.astype(jnp.float32)
        pooled = jnp.sum(e * m[..., None], axis=1)
        pooled = pooled / jnp.maximum(jnp.sum(m, axis=1, keepdims=True), 1.0)
        if norm:
            pooled = pooled / jnp.maximum(
                jnp.linalg.norm(pooled, axis=-1, keepdims=True), 1e-12)
        return pooled

    qo = enc(q_ids, q_mask, norm_q)
    b, n, l = p_ids.shape
    po = enc(p_ids.reshape(b * n, l), p_mask.reshape(b * n, l), norm_d)
    po = po.reshape(b, n, -1)
    score = jnp.einsum('bd,bnd->bn', qo, po) / jnp.sqrt(jnp.float32(qo.shape[-1]))
    T = float(temperature)
    if loss_type == 'kl':
        g = jax.nn.softmax(gold / T, axis=-1)
        ls = jax.nn.log_softmax(score / T, axis=-1)
        elem = g * (jnp.log(jnp.maximum(g, 1e-38)) - ls)
        return jnp.mean(elem) * (T * T)
    g = jax.nn.softmax(gold, axis=-1)
    s = jax.nn.softmax(score, axis=-1)
    return jnp.mean((s - g) ** 2)


# ----------------------------------------------------------------------------
# Main
# ----------------------------------------------------------------------------
if __name__ == "__main__":
    key = jax.random.PRNGKey(0)
    vocab, D = 64, 128                        # hidden dim lane-dense
    bsz, n_passages, qlen, plen = 2, 9, 8, 8  # 18 passage rows -> exercises the
                                              # pad-to-16 / multi-tile path

    k_emb, k_q, k_p, k_g = jax.random.split(key, 4)
    embedding = jax.random.normal(k_emb, (vocab, D), dtype=jnp.float32) * 0.05

    question_ids = jax.random.randint(k_q, (bsz, qlen), 0, vocab)
    question_mask = jnp.concatenate(
        [jnp.ones((bsz, qlen - 2), jnp.float32),
         jnp.zeros((bsz, 2), jnp.float32)], axis=1)
    passage_ids = jax.random.randint(k_p, (bsz, n_passages, plen), 0, vocab)
    passage_mask = jnp.concatenate(
        [jnp.ones((bsz, n_passages, plen - 1), jnp.float32),
         jnp.zeros((bsz, n_passages, 1), jnp.float32)], axis=2)
    gold_score = jax.random.normal(k_g, (bsz, n_passages), dtype=jnp.float32)

    model = InBatchKDPallas(embedding, norm_query=True, norm_doc=True,
                            loss_type='kl', temperature=1.0)
    loss, stats = model.forward(question_ids, question_mask, passage_ids,
                                passage_mask, gold_score)
    jax.block_until_ready(loss)

    ref = _reference_loss(embedding, question_ids, question_mask, passage_ids,
                          passage_mask, gold_score, True, True, 'kl', 1.0)
    err = abs(float(loss) - float(ref))
    assert err <= 1e-3 + 2e-2 * abs(float(ref)), (float(loss), float(ref))
    print("KERNEL_OK")
</pallas_src>

<mosaic_0001>
module attributes {stable_mosaic.version = 11 : i64} {
  func.func @kernel(%arg0: i32, %arg1: memref<2x8xi32, #tpu.memory_space<smem>>, %arg2: memref<2x8xf32, #tpu.memory_space<vmem>>, %arg3: memref<64x128xf32, #tpu.memory_space<vmem>>, %arg4: memref<2x128xbf16, #tpu.memory_space<vmem>>, %arg5: memref<2x8x128xf32, #tpu.memory_space<vmem>>) attributes {dimension_semantics = [#tpu.dimension_semantics<parallel>], iteration_bounds = array<i64: 1>, scalar_prefetch = 1 : i64, scratch_operands = 1 : i64, tpu.core_type = #tpu.core_type<tc>, window_params = [{transform_indices = @transform_0, window_bounds = array<i64: 2, 8>}, {pipeline_mode = #tpu.pipeline_mode<synchronous>, transform_indices = @transform_1, window_bounds = array<i64: 64, 128>}, {transform_indices = @transform_2, window_bounds = array<i64: 2, 128>}]} {
    %c2_i32 = arith.constant 2 : i32
    %0 = arith.muli %arg0, %c2_i32 : i32
    %c0_i32 = arith.constant 0 : i32
    %c2_i32_0 = arith.constant 2 : i32
    %1 = arith.addi %c0_i32, %c2_i32_0 : i32
    %c1_i32 = arith.constant 1 : i32
    scf.for %arg6 = %c0_i32 to %1 step %c1_i32  : i32 {
      %c0_i32_12 = arith.constant 0 : i32
      %c8_i32 = arith.constant 8 : i32
      %24 = arith.addi %c0_i32_12, %c8_i32 : i32
      %c1_i32_13 = arith.constant 1 : i32
      scf.for %arg7 = %c0_i32_12 to %24 step %c1_i32_13  : i32 {
        %25 = arith.addi %0, %arg6 : i32
        %26 = arith.index_cast %25 : i32 to index
        %27 = arith.index_cast %arg7 : i32 to index
        %28 = memref.load %arg1[%26, %27] : memref<2x8xi32, #tpu.memory_space<smem>>
        %29 = arith.index_cast %28 : i32 to index
        %c0_15 = arith.constant 0 : index
        %30 = vector.load %arg3[%29, %c0_15] : memref<64x128xf32, #tpu.memory_space<vmem>>, vector<1x128xf32>
        %31 = arith.index_cast %arg6 : i32 to index
        %32 = arith.index_cast %arg7 : i32 to index
        %c0_16 = arith.constant 0 : index
        %33 = vector.load %arg5[%31, %32, %c0_16] : memref<2x8x128xf32, #tpu.memory_space<vmem>>, vector<1x1x128xf32>
        %34 = vector.shape_cast %33 : vector<1x1x128xf32> to vector<1x128xf32>
        %35 = vector.shape_cast %30 : vector<1x128xf32> to vector<1x1x128xf32>
        tpu.vector_store %arg5[%31, %32, %c0_16], %35 {strides = array<i32>} : memref<2x8x128xf32, #tpu.memory_space<vmem>>, vector<1x1x128xf32>,
      }
      %c8_i32_14 = arith.constant 8 : i32
    }
    %c2_i32_1 = arith.constant 2 : i32
    %c0 = arith.constant 0 : index
    %c0_2 = arith.constant 0 : index
    %2 = vector.load %arg2[%c0, %c0_2] : memref<2x8xf32, #tpu.memory_space<vmem>>, vector<2x8xf32>
    %3 = vector.shape_cast %2 : vector<2x8xf32> to vector<2x1x8xf32>
    %c0_3 = arith.constant 0 : index
    %c0_4 = arith.constant 0 : index
    %c0_5 = arith.constant 0 : index
    %4 = vector.load %arg5[%c0_3, %c0_4, %c0_5] : memref<2x8x128xf32, #tpu.memory_space<vmem>>, vector<2x8x128xf32>
    "tpu.trace_start"() <{level = 10 : i32, message = "bql,bld->bqd"}> : () -> ()
    %cst = arith.constant dense<0.000000e+00> : vector<2x1x128xf32>
    %5 = tpu.matmul %3, %4, %cst {dimension_numbers = #tpu.dot_dimension_numbers<[2], [1], [1], [2], [0, 0, 0, 1, 1, 2], [0], [0]>} : vector<2x1x8xf32>, vector<2x8x128xf32>, vector<2x1x128xf32> -> vector<2x1x128xf32>
    "tpu.trace_stop"() : () -> ()
    %6 = vector.shape_cast %5 : vector<2x1x128xf32> to vector<2x128xf32>
    %cst_6 = arith.constant dense<0.000000e+00> : vector<2xf32>
    %7 = vector.multi_reduction <add>, %2, %cst_6 [1] : vector<2x8xf32> to vector<2xf32>
    %8 = vector.shape_cast %7 : vector<2xf32> to vector<2x1xf32>
    %cst_7 = arith.constant 1.000000e+00 : f32
    %9 = vector.broadcast %cst_7 : f32 to vector<2x1xf32>
    %10 = arith.maximumf %8, %9 : vector<2x1xf32>
    %11 = tpu.reciprocal %10 {approx = true} : vector<2x1xf32> -> vector<2x1xf32>
    %12 = vector.broadcast %11 : vector<2x1xf32> to vector<2x128xf32>
    %13 = arith.mulf %6, %12 : vector<2x128xf32>
    %14 = arith.mulf %13, %13 : vector<2x128xf32>
    %cst_8 = arith.constant dense<0.000000e+00> : vector<2xf32>
    %15 = vector.multi_reduction <add>, %14, %cst_8 [1] : vector<2x128xf32> to vector<2xf32>
    %16 = vector.shape_cast %15 : vector<2xf32> to vector<2x1xf32>
    %cst_9 = arith.constant 1.000000e-24 : f32
    %17 = vector.broadcast %cst_9 : f32 to vector<2x1xf32>
    %18 = arith.maximumf %16, %17 : vector<2x1xf32>
    %19 = math.rsqrt %18 : vector<2x1xf32>
    %20 = vector.broadcast %19 : vector<2x1xf32> to vector<2x128xf32>
    %21 = arith.mulf %13, %20 : vector<2x128xf32>
    %22 = arith.truncf %21 : vector<2x128xf32> to vector<2x128xbf16>
    %c0_10 = arith.constant 0 : index
    %c0_11 = arith.constant 0 : index
    %23 = vector.load %arg4[%c0_10, %c0_11] : memref<2x128xbf16, #tpu.memory_space<vmem>>, vector<2x128xbf16>
    tpu.vector_store %arg4[%c0_10, %c0_11], %22 {strides = array<i32>} : memref<2x128xbf16, #tpu.memory_space<vmem>>, vector<2x128xbf16>,
    return
  }
  func.func @transform_0(%arg0: i32, %arg1: memref<2x8xi32, #tpu.memory_space<smem>>) -> (i32, i32) {
    %c0_i32 = arith.constant 0 : i32
    %c0_i32_0 = arith.constant 0 : i32
    return %arg0, %c0_i32 : i32, i32
  }
  func.func @transform_1(%arg0: i32, %arg1: memref<2x8xi32, #tpu.memory_space<smem>>) -> (i32, i32) {
    %c0_i32 = arith.constant 0 : i32
    %c0_i32_0 = arith.constant 0 : i32
    %c0_i32_1 = arith.constant 0 : i32
    return %c0_i32, %c0_i32_0 : i32, i32
  }
  func.func @transform_2(%arg0: i32, %arg1: memref<2x8xi32, #tpu.memory_space<smem>>) -> (i32, i32) {
    %c0_i32 = arith.constant 0 : i32
    %c0_i32_0 = arith.constant 0 : i32
    return %arg0, %c0_i32 : i32, i32
  }
}

</mosaic_0001>

<bundles_post_ra>
// kernel: tpu_custom_call.1
= control target key start
LH: loop header
LB: loop body
LE: loop exit
PB: predicated region body
PF: predicated region fallthrough
CT: control target
= control target key end

     0   :  { %s566_s0 = inlined_call_operand.hbm [shape: s32[2,8], index: 0, kind: input, shape index: {}]   ;;  %s567_s1 = inlined_call_operand.vmem [shape: f32[2,8], index: 1, kind: input, shape index: {}]   ;;  %s568_s2 = inlined_call_operand.hbm [shape: f32[64,128], index: 2, kind: input, shape index: {}]   ;;  %s569_s3 = inlined_call_operand.hbm [shape: bf16[2,128], index: 3, kind: output, shape index: {}]  }
   0x1   :  { %s420_s14 = scalar_lea.hbm %s566_s0, 32 }
   0x2   :  { %p421_p0 = scmp.ne.s32.totalorder %s566_s0, %s420_s14  ;;  %p424_p1 = scmp.lt.u32.totalorder %s420_s14, %s566_s0 }
   0x4   :  { %p426_p2 = pnand %p424_p1, %p421_p0 }
   0x6   :  { %429 = shalt.err (!%p426_p2)  }
   0x7   :  { %s496_s19 = smov [#allocation4]  }
   0x8   :  { %9 = dma.hbm_to_smem %s566_s0, 32, %s496_s19, [#allocation3] }
   0x9   :  { %482 = dma.done.wait [#allocation3], 32 }
   0xa   :  { %483 = vsyncadd [#allocation3], 4294967264 }
   0xb   :  { %11 = sfence }
   0xc   :  { %12 = vsyncpa [#allocation6], 0 }
   0xd   :  { %13 = vsyncpa [#allocation7], 0  ;;  %s497_s22 = smov [#allocation5]   ;;  %s430_s26 = scalar_lea.hbm %s568_s2, 1024 }
   0xe   :  { %s21_s23 = sshll.u32 %s497_s22, 4  ;;  %p431_p3 = scmp.ne.s32.totalorder %s568_s2, %s430_s26  ;;  %s22_s23 = int_to_ptr.vmem [resolvable:$true] %s21_s23 }
   0xf   :  { %p434_p4 = scmp.lt.u32.totalorder %s430_s26, %s568_s2 }
  0x11   :  { %p436_p5 = pnand %p434_p4, %p431_p3 }
  0x13   :  { %439 = shalt.err (!%p436_p5)
}
  0x14   :  { %s440_s0 = scalar_lea.vmem %s22_s23, 1024  ;;  %p445_p7 = scmp.lt.s32.totalorder %s22_s23, %s22_s23 }
  0x15   :  { %p441_p6 = scmp.ne.s32.totalorder %s22_s23, %s440_s0  ;;  %p446_p8 = scmp.lt.s32.totalorder %s440_s0, %s440_s0 }
  0x17   :  { %p447_p9 = por %p446_p8, %p445_p7 }
  0x19   :  { %p448_p10 = pnand %p447_p9, %p441_p6 }
  0x1b   :  { %451 = shalt.err (!%p448_p10)
}
  0x1c   :  { %s498_s4 = smov 128   ;;  %s499_s5 = smov 8  }
  0x1d   :  { %27 = dma.hbm_to_vmem [thread:$0]  %s568_s2, 1024, %s22_s23, [#allocation6], %s498_s4, %s498_s4, %s499_s5  }
  0x1e   :  { %484 = dma.done.wait [#allocation6], 1024  }
  0x1f   :  { %485 = vsyncadd [#allocation6], 4294966272  ;;  %s488_s8 = smov 0  }
  0x20 LB: > { %s492_s9 = smov 0   ;;  %s490_s8 = sphi %s488_s8, %s37_s8  }
  0x21 LB: >> { %s45_s10 = sshra.s32 %s494_s9, 7  ;;  %s50_s11 = sand.u32 127, %s494_s9  ;;  %s494_s9 = sphi %s492_s9, %s43_s9  }
  0x22   : >> { %s47_s12 = sadd.s32 %s490_s8, %s45_s10  ;;  %s373_s15 = sshll.u32 %s490_s8, 3 }
  0x23   : >> { %s372_s13 = sshll.u32 %s47_s12, 7  ;;  %s56_s17 = sadd.s32 %s494_s9, %s373_s15 }
  0x24   : >> { %s51_s14 = sadd.s32 %s372_s13, %s50_s11  ;;  %s57_s2 = scalar_lea.vmem [#allocation2], %s56_s17 }
  0x25   : >> { %s52_s16 = sld [smem:[#allocation4 + %s51_s14]]  ;;  %s43_s9 = sadd.s32 1, %s494_s9  }
  0x26   : >> { %p40_p11 = scmp.ge.s32.totalorder %s43_s9, 8  }
  0x27   : > { %s37_s8 = sadd.s32 (%p40_p11), 1, %s490_s8  }
  0x28   : > { %42 = sbr.rel (!%p40_p11) target bundleno = 33 (0x21), region = 48  ;;  %p34_p12 = scmp.ge.s32.totalorder (%p40_p11), %s37_s8, 2  }
  0x2b   : >> { %s53_s18 = scalar_lea.vmem [#allocation5], %s52_s16 }
  0x2c   : >> { %v54_v0 = vld [vmem:[%s53_s18] sm:$0x1] }
  0x2d   : >> { %58 = vst [vmem:[%s57_s2] sm:$0x1] %v54_v0 }
  0x2f   :  { %36 = sbr.rel (!%p34_p12) target bundleno = 32 (0x20), region = 59  ;;  %v64_v2 = vlaneseq (%p34_p12)  ;;  %v500_v3 = vmov (%p34_p12), 0.0   ;;  %vm501_vm0 = vmmov (%p34_p12), 0   ;;  %v59_v4 = vld [vmem:[%s567_s1] sm:$0x3] (%p34_p12)  ;;  %vm230_vm1 = vcmask (%p34_p12), 58368  }
  0x30   :  { %381 = vmatprep.subr.mxu0 (%p34_p12), %v500_v3  ;;  %383 = vmatprep.mubr.msk.f32.mxu0 (%p34_p12), %vm501_vm0, %v500_v3  ;;  %v502_v6 = vmov (%p34_p12), 1966171168   ;;  %v231_v9 = vsel (%p34_p12), %vm230_vm1, %v59_v4, 0.0  ;;  %vm85_vm2 = vcmask (%p34_p12), 64512   ;;  %vm247_vm3 = vcmask (%p34_p12), 1041409   ;;  %s504_s1 = smov (%p34_p12), [#allocation8]  }
  0x31   :  { %v62_v7 = vunpack.c.l.s4 (%p34_p12), %v502_v6  ;;  %v65_v8 = vshrl.u32 (%p34_p12), %v64_v2, 7  ;;  %386 = vmatprep.subr.mxu1 (%p34_p12), %v500_v3  ;;  %388 = vmatprep.mubr.msk.f32.mxu1 (%p34_p12), %vm501_vm0, %v500_v3  ;;  %vm250_vm4 = vcmask (%p34_p12), 1041408   ;;  %v503_v33 = vmov (%p34_p12), 1935823168   ;;  %s349_s21 = sshll.u32 (%p34_p12), %s504_s1, 4  ;;  %s350_s21 = int_to_ptr.vmem [resolvable:$true] %s349_s21 }
  0x32   :  { %232 = vadd.xlane.f32.xlu0 (%p34_p12), %v231_v9  ;;  %v295_v34 = vunpack.c.l.s4 (%p34_p12), %v503_v33  ;;  %s452_s22 = scalar_lea.vmem (%p34_p12), %s350_s21, 16  ;;  %s456_s23 = scalar_lea.vmem (%p34_p12), %s350_s21, 32 }
  0x33   :  { %v63_v10 = vunpack.c.0.s8 (%p34_p12), %v62_v7  ;;  %p453_p13 = scmp.ne.s32.totalorder (%p34_p12), %s350_s21, %s452_s22  ;;  %p457_p0 = scmp.lt.s32.totalorder (%p34_p12), %s350_s21, %s350_s21 }
  0x34   :  { %v83_v1 = vld [vmem:[#allocation2] sm:$0xff] (%p34_p12)  ;;  %v84_v5 = vld [vmem:[#allocation2 + $0x8] sm:$0xff] (%p34_p12)  ;;  %v296_v38 = vunpack.c.0.s8 (%p34_p12), %v295_v34  ;;  %p458_p1 = scmp.lt.s32.totalorder (%p34_p12), %s456_s23, %s452_s22 }
  0x35   :  { %382 = vmatpush3.msra.mxu0 (%p34_p12), %v83_v1  ;;  %387 = vmatpush3.msra.mxu1 (%p34_p12), %v84_v5  ;;  %v66_v11 = vsub.s32 (%p34_p12), %v63_v10, %v65_v8 }
  0x36   :  { %v299_v43 = vsub.s32 %v296_v38, %v65_v8  ;;  %p459_p2 = por %p458_p1, %p457_p0 }
  0x37   :  { %v67_v12 = vrot.slane %v59_v4, %v66_v11 }
  0x38   :  { %p460_p3 = pnand %p459_p2, %p453_p13 }
  0x39   :  { %v75_v13 = vrot.slane %v67_v12, %v66_v11  ;;  %v68_v14 = vcombine.high %v67_v12, %v67_v12 }
  0x3b   :  { %384 = vmatmul.mubr.msk.f32.vlgmr.msra.gmra.mrb[0].mxu0 %vm85_vm2, %v75_v13  ;;  %v82_v15 = vrot.slane %v68_v14, %v66_v11 }
  0x3d   :  { %389 = vmatmul.mubr.msk.f32.vlgmr.msra.gmra.mrb[0].mxu1 %vm85_vm2, %v82_v15 }
  0xbf   :  { %v233_v16 = vpop.xlane.xlu0 %232 }
  0xc0   :  { %v234_v17 = vmax.f32 %v233_v16, 1.0 }
  0xc2   :  { %416 = vrcp.f32 %v234_v17 }
  0xcc   :  { %v417_v18 = vpop.eup %416 }
  0xcd   :  { %v237_v19 = vrot.slane %v417_v18, 1 }
 0x10e   :  { %v154_v20 = vpop.f32.mrb[0].mxu0 }
 0x10f   :  { %v385_v21 = vpop.f32.mrb[1].mxu0  ;;  %v240_v23 = vmul.f32 %v417_v18, %v154_v20 }
 0x110   :  { %v226_v22 = vpop.f32.mrb[0].mxu1 }
 0x111   :  { %v241_v24 = vmul.f32 %v237_v19, %v226_v22  ;;  %v390_v25 = vpop.f32.mrb[1].mxu1  ;;  %v242_v27 = vmul.f32 %v240_v23, %v240_v23 }
 0x113   :  { %v243_v26 = vmul.f32 %v241_v24, %v241_v24 }
 0x115   :  { %v246_v28 = vrot.slane %v243_v26, 7 }
 0x117   :  { %v248_v29 = vsel %vm247_vm3, %v246_v28, %v242_v27 }
 0x118   :  { %v251_v30 = vsel %vm250_vm4, %v248_v29, 0.0 }
 0x119   :  { %252 = vadd.xlane.f32.xlu0 %v251_v30 }
 0x1a6   :  { %v253_v31 = vpop.xlane.xlu0 %252 }
 0x1a7   :  { %v254_v32 = vmax.f32 %v253_v31, 1e-24 }
 0x1a9   :  { %418 = vrsqrt.f32 %v254_v32 }
 0x1b3   :  { %v419_v35 = vpop.eup %418 }
 0x1b4   :  { %v257_v36 = vrot.slane %v419_v35, 1  ;;  %v260_v37 = vmul.f32 %v419_v35, %v240_v23 }
 0x1b6   :  { %v261_v39 = vmul.f32 %v257_v36, %v241_v24  ;;  %v262_v40 = vpack.c.bf16 %v260_v37, %v260_v37 }
 0x1b8   :  { %v263_v41 = vpack.c.bf16 %v261_v39, %v261_v39  ;;  %v272_v42 = vrot.slane %v262_v40, %v66_v11 }
 0x1ba   :  { %v279_v44 = vrot.slane %v272_v42, %v66_v11  ;;  %v286_v45 = vrot.slane %v263_v41, %v66_v11 }
 0x1bc   :  { %v293_v46 = vrot.slane %v286_v45, %v66_v11  ;;  %v300_v47 = vrot.slane %v279_v44, %v299_v43 }
 0x1be   :  { %v314_v48 = vrot.slane %v293_v46, %v299_v43  ;;  %v307_v49 = vrot.slane %v300_v47, %v299_v43 }
 0x1c0   :  { %v321_v50 = vrot.slane %v314_v48, %v299_v43  ;;  %v322_v52 = vunpack.c.l.b16 %v307_v49 }
 0x1c2   :  { %v323_v51 = vunpack.c.l.b16 %v321_v50 }
 0x1c4   :  { %v324_v53 = vrot.slane %v323_v51, 7 }
 0x1c6   :  { %v325_v54 = vsel %vm247_vm3, %v324_v53, %v322_v52 }
 0x1c7   :  { %v326_v55 = vpack.c.b16 %v325_v54, %v325_v54 }
 0x1c9   :  { %v333_v56 = vrot.slane %v326_v55, %v66_v11 }
 0x1cb   :  { %376 = vst.sshfl [vmem:[#allocation8] sm:$0x1 pattern:$0x73625140] %v333_v56 }
 0x1cc   :  { %463 = shalt.err (!%p460_p3)
}
 0x1cd   :  { %s464_s26 = scalar_lea.hbm %s569_s3, 16 }
 0x1ce   :  { %p465_p4 = scmp.ne.s32.totalorder %s569_s3, %s464_s26  ;;  %p468_p5 = scmp.lt.u32.totalorder %s464_s26, %s569_s3 }
 0x1d0   :  { %p470_p6 = pnand %p468_p5, %p465_p4 }
 0x1d2   :  { %473 = shalt.err (!%p470_p6)
}
 0x1d3   :  { %352 = dma.vmem_to_hbm [thread:$0]  %s350_s21, 16, %s569_s3, [#allocation7]  }
 0x1d4   :  { %486 = dma.done.wait [#allocation7], 16  }
 0x1d5   :  { %487 = vsyncadd [#allocation7], 4294967280 }
 0x1d6   :  { %356 = vsyncpa [#allocation6], 1 }
 0x1d7   :  { %357 = vsyncpa [#allocation7], 1 }

</bundles_post_ra>
